<compile_context>
chip_gen: v6e
topology: v6e:2x2x1
jax: 0.10.0
libtpu: 0.0.40
codegen_flags: <defaults>
</compile_context>

<pallas_src>
import functools

import jax
import jax.numpy as jnp
from jax.experimental import pallas as pl
from jax.experimental.pallas import tpu as pltpu


def multi_infer_kernel(rc0_ref, mrow_ref, mcol_ref, wcls_ref, wcomb_ref, wlm_ref,
                       clsb_ref, featb_ref, out_ref, *, nhops, L, D, C):
    """One batch element per grid step: decomposed multi-hop table filling."""
    D2 = 2 * D
    f32, bf16 = jnp.float32, jnp.bfloat16

    def mm(x, w):  # bf16 operands, f32 accumulation on the MXU
        return jnp.dot(x, w, preferred_element_type=f32)

    wcls = wcls_ref[...]        # [2D, C]      bf16
    wcomb = wcomb_ref[...]      # [2D, 2D]     bf16  (wf_feat + wcls @ wf_probs)
    wlm = wlm_ref[...]          # [C, 2*2D]    bf16  (wf_lmi | wf_lmj)
    cls_bias = clsb_ref[...]    # [2L, C]      f32   (top zeros / bottom bcls)
    feat_bias = featb_ref[...]  # [2L, 2D]     f32   (top zeros / bottom bfeat + bcls@wf_probs)

    # Upper-triangular pairwise valid-token mask, built in-kernel (VPU only),
    # hoisted out of the hop loop and pre-broadcast to C lanes.
    mrow = mrow_ref[0]          # [1, L] f32  -> m[j]
    mcol = mcol_ref[0]          # [L, 1] f32  -> m[i]
    ii = jax.lax.broadcasted_iota(jnp.int32, (L, L), 0)
    jj = jax.lax.broadcasted_iota(jnp.int32, (L, L), 1)
    pmask = mcol * mrow * (ii <= jj).astype(f32)                     # [L, L]
    mask3 = jnp.broadcast_to(pmask[:, :, None], (L, L, C))           # [L, L, C]

    # RC = [R ; C] stacked along rows: features_h[i,j] = R_h[i] + C_h[j].
    RC = rc0_ref[0]             # [2L, 2D] bf16  (hop 0: [bert | 0 ; 0 | bert])

    for _ in range(nhops):      # static, unrolled
        # cls_linear, decomposed: logits_h[i,j] = ci[i] + cj[j]  (cj carries bcls)
        cicj = mm(RC, wcls) + cls_bias                               # [2L, C] f32
        ci = cicj[:L]
        cj = cicj[L:]
        probs = ci[:, None, :] + cj[None, :, :]                      # [L, L, C] f32
        masked = probs * mask3
        lm = jnp.maximum(jnp.max(masked, axis=0),                    # torch max dim=1
                         jnp.max(masked, axis=2 - 1))                # torch max dim=2
        # feature_linear with the probs term folded into wcomb (see header).
        upd = mm(RC, wcomb)                                          # [2L, 2D] f32
        lmc = mm(lm.astype(bf16), wlm)                               # [L, 2*2D] f32
        lm2 = jnp.concatenate([lmc[:, :D2], lmc[:, D2:]], axis=0)    # [2L, 2D]
        RC = (upd + lm2 + feat_bias).astype(bf16)                    # bf16 state carry

    # Final cls_linear + lane-contiguous store (single reshape, no slice/concat chain).
    cicj = mm(RC, wcls) + cls_bias                                   # [2L, C] f32
    logits = cicj[:L][:, None, :] + cicj[L:][None, :, :]             # [L, L, C] f32
    out_ref[...] = logits.reshape(1, L, L * C)


def multi_infer_forward(bert_feature, masks, wcls, bcls, wfeat, bfeat, *, nhops):
    """Wrapper: weight folding/splits + layout prep (XLA side), one Pallas call."""
    B, L, D = bert_feature.shape
    D2 = 2 * D
    C = wcls.shape[1]
    f32, bf16 = jnp.float32, jnp.bfloat16

    wcls_f = wcls.astype(f32)
    wfeat_f = wfeat.astype(f32)
    wf_feat = wfeat_f[:D2]                    # multiplies features (concat(bert_i, bert_j) at hop 0)
    wf_lmi = wfeat_f[D2:D2 + C]               # multiplies lm_i
    wf_lmj = wfeat_f[D2 + C:D2 + 2 * C]       # multiplies lm_j
    wf_probs = wfeat_f[D2 + 2 * C:]           # multiplies probs (folded below)

    # Fold the probs matmul into the feature weight (exact algebraic identity).
    w_comb = (wf_feat + wcls_f @ wf_probs).astype(bf16)                      # [2D, 2D]
    w_lm = jnp.concatenate([wf_lmi, wf_lmj], axis=1).astype(bf16)            # [C, 2*2D]
    wcls_bf = wcls.astype(bf16)                                              # [2D, C]

    bcls_row = bcls.reshape(1, C).astype(f32)
    bfeat_row = bfeat.reshape(1, D2).astype(f32)
    # Bias slabs aligned with the [R ; C] row stacking (hoisted out of the loop).
    cls_bias2 = jnp.concatenate([jnp.zeros((L, C), f32),
                                 jnp.broadcast_to(bcls_row, (L, C))], axis=0)          # [2L, C]
    feat_bias_bot = bfeat_row + bcls_row @ wf_probs                                    # [1, 2D]
    feat_bias2 = jnp.concatenate([jnp.zeros((L, D2), f32),
                                  jnp.broadcast_to(feat_bias_bot, (L, D2))], axis=0)   # [2L, 2D]

    # Hop-0 state: features_0 = concat(bert_i, bert_j) = [bert|0](i) + [0|bert](j).
    bert_bf = bert_feature.astype(bf16)
    zeros_bl = jnp.zeros((B, L, D), bf16)
    rc0 = jnp.concatenate([jnp.concatenate([bert_bf, zeros_bl], axis=-1),
                           jnp.concatenate([zeros_bl, bert_bf], axis=-1)], axis=1)     # [B, 2L, 2D]

    mask_f = masks[:, :L].astype(f32)
    mask_row = mask_f.reshape(B, 1, L)
    mask_col = mask_f.reshape(B, L, 1)

    kernel = functools.partial(multi_infer_kernel, nhops=nhops, L=L, D=D, C=C)

    out = pl.pallas_call(
        kernel,
        out_shape=jax.ShapeDtypeStruct((B, L, L * C), f32),
        grid_spec=pltpu.PrefetchScalarGridSpec(
            num_scalar_prefetch=0,
            grid=(B,),
            in_specs=[
                pl.BlockSpec((1, 2 * L, D2), lambda b: (b, 0, 0)),   # rc0        bf16
                pl.BlockSpec((1, 1, L), lambda b: (b, 0, 0)),        # mask_row   f32
                pl.BlockSpec((1, L, 1), lambda b: (b, 0, 0)),        # mask_col   f32
                pl.BlockSpec((D2, C), lambda b: (0, 0)),             # wcls       bf16
                pl.BlockSpec((D2, D2), lambda b: (0, 0)),            # w_comb     bf16
                pl.BlockSpec((C, 2 * D2), lambda b: (0, 0)),         # w_lm       bf16
                pl.BlockSpec((2 * L, C), lambda b: (0, 0)),          # cls_bias2  f32
                pl.BlockSpec((2 * L, D2), lambda b: (0, 0)),         # feat_bias2 f32
            ],
            out_specs=pl.BlockSpec((1, L, L * C), lambda b: (b, 0, 0)),
        ),
        compiler_params=pltpu.CompilerParams(
            dimension_semantics=("parallel",)),   # independent batch elements -> both v7x TCs
    )(rc0, mask_row, mask_col, wcls_bf, w_comb, w_lm, cls_bias2, feat_bias2)

    return out.reshape(B, L, L, C)


def reference_forward(bert_feature, masks, wcls, bcls, wfeat, bfeat, *, nhops):
    """Pure-JAX reference mirroring the PyTorch forward / multi_hops structure.

    Uses the same matmul precision policy as the kernel (bf16 inputs, f32
    accumulation) but the full [B, L, L, *] tensors, so it checks the algebraic
    decomposition independently.
    """
    B, L, D = bert_feature.shape
    C = wcls.shape[1]

    def mm(x, w):
        return jnp.dot(x.astype(jnp.bfloat16), w.astype(jnp.bfloat16),
                       preferred_element_type=jnp.float32)

    feat_i = jnp.broadcast_to(bert_feature[:, :, None, :], (B, L, L, D))
    feat_j = jnp.broadcast_to(bert_feature[:, None, :, :], (B, L, L, D))
    features = jnp.concatenate([feat_i, feat_j], axis=-1)
    mask = masks[:, :L].astype(jnp.float32)
    mask2d = jnp.triu(mask[:, :, None] * mask[:, None, :])[..., None]

    logits = mm(features, wcls) + bcls.reshape(-1)
    for _ in range(nhops):
        probs = logits
        masked = probs * mask2d
        lm = jnp.maximum(jnp.max(masked, axis=1), jnp.max(masked, axis=2))
        lm_i = jnp.broadcast_to(lm[:, :, None, :], (B, L, L, C))
        lm_j = jnp.broadcast_to(lm[:, None, :, :], (B, L, L, C))
        new_feat = jnp.concatenate([features, lm_i, lm_j, probs], axis=-1)
        features = mm(new_feat, wfeat) + bfeat.reshape(-1)
        logits = mm(features, wcls) + bcls.reshape(-1)
    return logits


if __name__ == "__main__":
    # Small, BERT-consistent shapes: L = max_sequence_len, D = bert_feature_dim
    B, L, D, C, nhops, vocab = 2, 8, 32, 4, 2, 30
    D2, F = 2 * D, 2 * D + 3 * C

    key = jax.random.PRNGKey(0)
    k_tok, k_emb, k_wc, k_bc, k_wf, k_bf = jax.random.split(key, 6)

    tokens = jax.random.randint(k_tok, (B, L), 0, vocab)
    lengths = jnp.array([L, L - 2])
    masks = (jnp.arange(L)[None, :] < lengths[:, None]).astype(jnp.float32)   # [B, L]

    # Deterministic synthetic "BERT" feature: embedding lookup (dropout = identity).
    emb_table = 0.1 * jax.random.normal(k_emb, (vocab, D), jnp.float32)
    bert_feature = emb_table[tokens]                                          # [B, L, D]

    # Linear params stored as [in, out] (equivalent to torch Linear semantics).
    wcls = 0.10 * jax.random.normal(k_wc, (D2, C), jnp.float32)
    bcls = 0.10 * jax.random.normal(k_bc, (1, C), jnp.float32)
    wfeat = 0.05 * jax.random.normal(k_wf, (F, D2), jnp.float32)
    bfeat = 0.05 * jax.random.normal(k_bf, (1, D2), jnp.float32)

    out = multi_infer_forward(bert_feature, masks, wcls, bcls, wfeat, bfeat, nhops=nhops)
    out = jax.block_until_ready(out)

    ref = reference_forward(bert_feature, masks, wcls, bcls, wfeat, bfeat, nhops=nhops)
    assert out.shape == (B, L, L, C)
    max_err = float(jnp.max(jnp.abs(out - ref)))
    # bf16 state carry + decomposed summation order vs the full-tensor reference.
    assert jnp.allclose(out, ref, atol=1e-2, rtol=1e-2), f"mismatch vs reference: {max_err}"

    print("KERNEL_OK")
</pallas_src>

<mosaic_0001>
module attributes {stable_mosaic.version = 11 : i64} {
  func.func @multi_infer_kernel(%arg0: i32, %arg1: memref<1x16x64xbf16, #tpu.memory_space<vmem>>, %arg2: memref<1x1x8xf32, #tpu.memory_space<vmem>>, %arg3: memref<1x8x1xf32, #tpu.memory_space<vmem>>, %arg4: memref<64x4xbf16, #tpu.memory_space<vmem>>, %arg5: memref<64x64xbf16, #tpu.memory_space<vmem>>, %arg6: memref<4x128xbf16, #tpu.memory_space<vmem>>, %arg7: memref<16x4xf32, #tpu.memory_space<vmem>>, %arg8: memref<16x64xf32, #tpu.memory_space<vmem>>, %arg9: memref<1x8x32xf32, #tpu.memory_space<vmem>>) attributes {dimension_semantics = [#tpu.dimension_semantics<parallel>], iteration_bounds = array<i64: 2>, scalar_prefetch = 0 : i64, scratch_operands = 0 : i64, tpu.core_type = #tpu.core_type<tc>, window_params = [{transform_indices = @transform_0, window_bounds = array<i64: 1, 16, 64>}, {transform_indices = @transform_1, window_bounds = array<i64: 1, 1, 8>}, {transform_indices = @transform_2, window_bounds = array<i64: 1, 8, 1>}, {pipeline_mode = #tpu.pipeline_mode<synchronous>, transform_indices = @transform_3, window_bounds = array<i64: 64, 4>}, {pipeline_mode = #tpu.pipeline_mode<synchronous>, transform_indices = @transform_4, window_bounds = array<i64: 64, 64>}, {pipeline_mode = #tpu.pipeline_mode<synchronous>, transform_indices = @transform_5, window_bounds = array<i64: 4, 128>}, {pipeline_mode = #tpu.pipeline_mode<synchronous>, transform_indices = @transform_6, window_bounds = array<i64: 16, 4>}, {pipeline_mode = #tpu.pipeline_mode<synchronous>, transform_indices = @transform_7, window_bounds = array<i64: 16, 64>}, {transform_indices = @transform_8, window_bounds = array<i64: 1, 8, 32>}]} {
    %c0 = arith.constant 0 : index
    %c0_0 = arith.constant 0 : index
    %0 = vector.load %arg4[%c0, %c0_0] : memref<64x4xbf16, #tpu.memory_space<vmem>>, vector<64x4xbf16>
    %c0_1 = arith.constant 0 : index
    %c0_2 = arith.constant 0 : index
    %1 = vector.load %arg5[%c0_1, %c0_2] : memref<64x64xbf16, #tpu.memory_space<vmem>>, vector<64x64xbf16>
    %c0_3 = arith.constant 0 : index
    %c0_4 = arith.constant 0 : index
    %2 = vector.load %arg6[%c0_3, %c0_4] : memref<4x128xbf16, #tpu.memory_space<vmem>>, vector<4x128xbf16>
    %c0_5 = arith.constant 0 : index
    %c0_6 = arith.constant 0 : index
    %3 = vector.load %arg7[%c0_5, %c0_6] : memref<16x4xf32, #tpu.memory_space<vmem>>, vector<16x4xf32>
    %c0_7 = arith.constant 0 : index
    %c0_8 = arith.constant 0 : index
    %4 = vector.load %arg8[%c0_7, %c0_8] : memref<16x64xf32, #tpu.memory_space<vmem>>, vector<16x64xf32>
    %c0_9 = arith.constant 0 : index
    %c0_10 = arith.constant 0 : index
    %c0_11 = arith.constant 0 : index
    %5 = vector.load %arg2[%c0_9, %c0_10, %c0_11] : memref<1x1x8xf32, #tpu.memory_space<vmem>>, vector<1x1x8xf32>
    %6 = vector.shape_cast %5 : vector<1x1x8xf32> to vector<1x8xf32>
    %c0_12 = arith.constant 0 : index
    %c0_13 = arith.constant 0 : index
    %c0_14 = arith.constant 0 : index
    %7 = vector.load %arg3[%c0_12, %c0_13, %c0_14] : memref<1x8x1xf32, #tpu.memory_space<vmem>>, vector<1x8x1xf32>
    %8 = vector.shape_cast %7 : vector<1x8x1xf32> to vector<8x1xf32>
    %9 = tpu.iota {dimensions = array<i32: 0>} : vector<8x8xi32>
    %10 = tpu.iota {dimensions = array<i32: 1>} : vector<8x8xi32>
    %11 = vector.broadcast %8 : vector<8x1xf32> to vector<8x8xf32>
    %12 = vector.broadcast %6 : vector<1x8xf32> to vector<8x8xf32>
    %13 = arith.mulf %11, %12 : vector<8x8xf32>
    %14 = arith.cmpi sle, %9, %10 : vector<8x8xi32>
    %15 = arith.extui %14 : vector<8x8xi1> to vector<8x8xi32>
    %16 = arith.sitofp %15 : vector<8x8xi32> to vector<8x8xf32>
    %17 = arith.mulf %13, %16 : vector<8x8xf32>
    %18 = vector.shape_cast %17 : vector<8x8xf32> to vector<8x8x1xf32>
    %19 = vector.shape_cast %18 : vector<8x8x1xf32> to vector<8x8x1xf32>
    %20 = vector.broadcast %19 : vector<8x8x1xf32> to vector<8x8x4xf32>
    %c0_15 = arith.constant 0 : index
    %c0_16 = arith.constant 0 : index
    %c0_17 = arith.constant 0 : index
    %21 = vector.load %arg1[%c0_15, %c0_16, %c0_17] : memref<1x16x64xbf16, #tpu.memory_space<vmem>>, vector<1x16x64xbf16>
    %22 = vector.shape_cast %21 : vector<1x16x64xbf16> to vector<16x64xbf16>
    %cst = arith.constant dense<0.000000e+00> : vector<16x4xf32>
    %23 = tpu.matmul %22, %0, %cst {dimension_numbers = #tpu.dot_dimension_numbers<[1], [0], [0], [1], [0, 0, 1, 1], [], []>} : vector<16x64xbf16>, vector<64x4xbf16>, vector<16x4xf32> -> vector<16x4xf32>
    %24 = arith.addf %23, %3 : vector<16x4xf32>
    %25 = vector.extract_strided_slice %24 {offsets = [0, 0], sizes = [8, 4], strides = [1, 1]} : vector<16x4xf32> to vector<8x4xf32>
    %26 = vector.extract_strided_slice %24 {offsets = [8, 0], sizes = [8, 4], strides = [1, 1]} : vector<16x4xf32> to vector<8x4xf32>
    %27 = vector.shape_cast %25 : vector<8x4xf32> to vector<8x1x4xf32>
    %28 = vector.shape_cast %26 : vector<8x4xf32> to vector<1x8x4xf32>
    %29 = vector.broadcast %27 : vector<8x1x4xf32> to vector<8x8x4xf32>
    %30 = vector.broadcast %28 : vector<1x8x4xf32> to vector<8x8x4xf32>
    %31 = arith.addf %29, %30 : vector<8x8x4xf32>
    %32 = arith.mulf %31, %20 : vector<8x8x4xf32>
    %cst_18 = arith.constant dense<0xFF800000> : vector<8x4xf32>
    %33 = vector.multi_reduction <maximumf>, %32, %cst_18 [0] : vector<8x8x4xf32> to vector<8x4xf32>
    %cst_19 = arith.constant dense<0xFF800000> : vector<8x4xf32>
    %34 = vector.multi_reduction <maximumf>, %32, %cst_19 [1] : vector<8x8x4xf32> to vector<8x4xf32>
    %35 = arith.maximumf %33, %34 : vector<8x4xf32>
    %cst_20 = arith.constant dense<0.000000e+00> : vector<16x64xf32>
    %36 = tpu.matmul %22, %1, %cst_20 {dimension_numbers = #tpu.dot_dimension_numbers<[1], [0], [0], [1], [0, 0, 1, 1], [], []>} : vector<16x64xbf16>, vector<64x64xbf16>, vector<16x64xf32> -> vector<16x64xf32>
    %37 = arith.truncf %35 : vector<8x4xf32> to vector<8x4xbf16>
    %cst_21 = arith.constant dense<0.000000e+00> : vector<8x128xf32>
    %38 = tpu.matmul %37, %2, %cst_21 {dimension_numbers = #tpu.dot_dimension_numbers<[1], [0], [0], [1], [0, 0, 1, 1], [], []>} : vector<8x4xbf16>, vector<4x128xbf16>, vector<8x128xf32> -> vector<8x128xf32>
    %39 = vector.extract_strided_slice %38 {offsets = [0, 0], sizes = [8, 64], strides = [1, 1]} : vector<8x128xf32> to vector<8x64xf32>
    %40 = vector.extract_strided_slice %38 {offsets = [0, 64], sizes = [8, 64], strides = [1, 1]} : vector<8x128xf32> to vector<8x64xf32>
    %41 = tpu.concatenate %39, %40 in 0 : vector<8x64xf32>, vector<8x64xf32> -> vector<16x64xf32>
    %42 = arith.addf %36, %41 : vector<16x64xf32>
    %43 = arith.addf %42, %4 : vector<16x64xf32>
    %44 = arith.truncf %43 : vector<16x64xf32> to vector<16x64xbf16>
    %cst_22 = arith.constant dense<0.000000e+00> : vector<16x4xf32>
    %45 = tpu.matmul %44, %0, %cst_22 {dimension_numbers = #tpu.dot_dimension_numbers<[1], [0], [0], [1], [0, 0, 1, 1], [], []>} : vector<16x64xbf16>, vector<64x4xbf16>, vector<16x4xf32> -> vector<16x4xf32>
    %46 = arith.addf %45, %3 : vector<16x4xf32>
    %47 = vector.extract_strided_slice %46 {offsets = [0, 0], sizes = [8, 4], strides = [1, 1]} : vector<16x4xf32> to vector<8x4xf32>
    %48 = vector.extract_strided_slice %46 {offsets = [8, 0], sizes = [8, 4], strides = [1, 1]} : vector<16x4xf32> to vector<8x4xf32>
    %49 = vector.shape_cast %47 : vector<8x4xf32> to vector<8x1x4xf32>
    %50 = vector.shape_cast %48 : vector<8x4xf32> to vector<1x8x4xf32>
    %51 = vector.broadcast %49 : vector<8x1x4xf32> to vector<8x8x4xf32>
    %52 = vector.broadcast %50 : vector<1x8x4xf32> to vector<8x8x4xf32>
    %53 = arith.addf %51, %52 : vector<8x8x4xf32>
    %54 = arith.mulf %53, %20 : vector<8x8x4xf32>
    %cst_23 = arith.constant dense<0xFF800000> : vector<8x4xf32>
    %55 = vector.multi_reduction <maximumf>, %54, %cst_23 [0] : vector<8x8x4xf32> to vector<8x4xf32>
    %cst_24 = arith.constant dense<0xFF800000> : vector<8x4xf32>
    %56 = vector.multi_reduction <maximumf>, %54, %cst_24 [1] : vector<8x8x4xf32> to vector<8x4xf32>
    %57 = arith.maximumf %55, %56 : vector<8x4xf32>
    %cst_25 = arith.constant dense<0.000000e+00> : vector<16x64xf32>
    %58 = tpu.matmul %44, %1, %cst_25 {dimension_numbers = #tpu.dot_dimension_numbers<[1], [0], [0], [1], [0, 0, 1, 1], [], []>} : vector<16x64xbf16>, vector<64x64xbf16>, vector<16x64xf32> -> vector<16x64xf32>
    %59 = arith.truncf %57 : vector<8x4xf32> to vector<8x4xbf16>
    %cst_26 = arith.constant dense<0.000000e+00> : vector<8x128xf32>
    %60 = tpu.matmul %59, %2, %cst_26 {dimension_numbers = #tpu.dot_dimension_numbers<[1], [0], [0], [1], [0, 0, 1, 1], [], []>} : vector<8x4xbf16>, vector<4x128xbf16>, vector<8x128xf32> -> vector<8x128xf32>
    %61 = vector.extract_strided_slice %60 {offsets = [0, 0], sizes = [8, 64], strides = [1, 1]} : vector<8x128xf32> to vector<8x64xf32>
    %62 = vector.extract_strided_slice %60 {offsets = [0, 64], sizes = [8, 64], strides = [1, 1]} : vector<8x128xf32> to vector<8x64xf32>
    %63 = tpu.concatenate %61, %62 in 0 : vector<8x64xf32>, vector<8x64xf32> -> vector<16x64xf32>
    %64 = arith.addf %58, %63 : vector<16x64xf32>
    %65 = arith.addf %64, %4 : vector<16x64xf32>
    %66 = arith.truncf %65 : vector<16x64xf32> to vector<16x64xbf16>
    %cst_27 = arith.constant dense<0.000000e+00> : vector<16x4xf32>
    %67 = tpu.matmul %66, %0, %cst_27 {dimension_numbers = #tpu.dot_dimension_numbers<[1], [0], [0], [1], [0, 0, 1, 1], [], []>} : vector<16x64xbf16>, vector<64x4xbf16>, vector<16x4xf32> -> vector<16x4xf32>
    %68 = arith.addf %67, %3 : vector<16x4xf32>
    %69 = vector.extract_strided_slice %68 {offsets = [0, 0], sizes = [8, 4], strides = [1, 1]} : vector<16x4xf32> to vector<8x4xf32>
    %70 = vector.shape_cast %69 : vector<8x4xf32> to vector<8x1x4xf32>
    %71 = vector.extract_strided_slice %68 {offsets = [8, 0], sizes = [8, 4], strides = [1, 1]} : vector<16x4xf32> to vector<8x4xf32>
    %72 = vector.shape_cast %71 : vector<8x4xf32> to vector<1x8x4xf32>
    %73 = vector.broadcast %70 : vector<8x1x4xf32> to vector<8x8x4xf32>
    %74 = vector.broadcast %72 : vector<1x8x4xf32> to vector<8x8x4xf32>
    %75 = arith.addf %73, %74 : vector<8x8x4xf32>
    %76 = vector.shape_cast %75 : vector<8x8x4xf32> to vector<1x8x32xf32>
    %c0_28 = arith.constant 0 : index
    %c0_29 = arith.constant 0 : index
    %c0_30 = arith.constant 0 : index
    %77 = vector.load %arg9[%c0_28, %c0_29, %c0_30] : memref<1x8x32xf32, #tpu.memory_space<vmem>>, vector<1x8x32xf32>
    tpu.vector_store %arg9[%c0_28, %c0_29, %c0_30], %76 {strides = array<i32>} : memref<1x8x32xf32, #tpu.memory_space<vmem>>, vector<1x8x32xf32>,
    return
  }
  func.func @transform_0(%arg0: i32) -> (i32, i32, i32) {
    %c0_i32 = arith.constant 0 : i32
    %c0_i32_0 = arith.constant 0 : i32
    %c0_i32_1 = arith.constant 0 : i32
    return %arg0, %c0_i32, %c0_i32_0 : i32, i32, i32
  }
  func.func @transform_1(%arg0: i32) -> (i32, i32, i32) {
    %c0_i32 = arith.constant 0 : i32
    %c0_i32_0 = arith.constant 0 : i32
    %c0_i32_1 = arith.constant 0 : i32
    return %arg0, %c0_i32, %c0_i32_0 : i32, i32, i32
  }
  func.func @transform_2(%arg0: i32) -> (i32, i32, i32) {
    %c0_i32 = arith.constant 0 : i32
    %c0_i32_0 = arith.constant 0 : i32
    %c0_i32_1 = arith.constant 0 : i32
    return %arg0, %c0_i32, %c0_i32_0 : i32, i32, i32
  }
  func.func @transform_3(%arg0: i32) -> (i32, i32) {
    %c0_i32 = arith.constant 0 : i32
    %c0_i32_0 = arith.constant 0 : i32
    %c0_i32_1 = arith.constant 0 : i32
    return %c0_i32, %c0_i32_0 : i32, i32
  }
  func.func @transform_4(%arg0: i32) -> (i32, i32) {
    %c0_i32 = arith.constant 0 : i32
    %c0_i32_0 = arith.constant 0 : i32
    %c0_i32_1 = arith.constant 0 : i32
    return %c0_i32, %c0_i32_0 : i32, i32
  }
  func.func @transform_5(%arg0: i32) -> (i32, i32) {
    %c0_i32 = arith.constant 0 : i32
    %c0_i32_0 = arith.constant 0 : i32
    %c0_i32_1 = arith.constant 0 : i32
    return %c0_i32, %c0_i32_0 : i32, i32
  }
  func.func @transform_6(%arg0: i32) -> (i32, i32) {
    %c0_i32 = arith.constant 0 : i32
    %c0_i32_0 = arith.constant 0 : i32
    %c0_i32_1 = arith.constant 0 : i32
    return %c0_i32, %c0_i32_0 : i32, i32
  }
  func.func @transform_7(%arg0: i32) -> (i32, i32) {
    %c0_i32 = arith.constant 0 : i32
    %c0_i32_0 = arith.constant 0 : i32
    %c0_i32_1 = arith.constant 0 : i32
    return %c0_i32, %c0_i32_0 : i32, i32
  }
  func.func @transform_8(%arg0: i32) -> (i32, i32, i32) {
    %c0_i32 = arith.constant 0 : i32
    %c0_i32_0 = arith.constant 0 : i32
    %c0_i32_1 = arith.constant 0 : i32
    return %arg0, %c0_i32, %c0_i32_0 : i32, i32, i32
  }
}

</mosaic_0001>

<bundles_post_ra>
// kernel: tpu_custom_call.1
= control target key start
LH: loop header
LB: loop body
LE: loop exit
PB: predicated region body
PF: predicated region fallthrough
CT: control target
= control target key end

     0   :  { %13 = vsyncpa [#allocation3], 0  ;;  %s2297_s0 = inlined_call_operand.vmem [shape: bf16[2,16,64], index: 0, kind: input, shape index: {}]   ;;  %s2298_s1 = inlined_call_operand.vmem [shape: f32[2,1,8], index: 1, kind: input, shape index: {}]   ;;  %s2299_s2 = inlined_call_operand.vmem [shape: f32[2,8,1], index: 2, kind: input, shape index: {}]   ;;  %s2300_s3 = inlined_call_operand.vmem [shape: bf16[64,4], index: 3, kind: input, shape index: {}]   ;;  %s2301_s4 = inlined_call_operand.vmem [shape: bf16[64,64], index: 4, kind: input, shape index: {}]   ;;  %s2302_s5 = inlined_call_operand.vmem [shape: bf16[4,128], index: 5, kind: input, shape index: {}]   ;;  %s2303_s6 = inlined_call_operand.vmem [shape: f32[16,4], index: 6, kind: input, shape index: {}]   ;;  %s2304_s7 = inlined_call_operand.vmem [shape: f32[16,64], index: 7, kind: input, shape index: {}]   ;;  %s2305_s8 = inlined_call_operand.hbm [shape: f32[2,8,32], index: 8, kind: output, shape index: {}]  }
   0x1   :  { %15 = vsyncpa [#allocation3 + $0x1], 0  ;;  %s1879_s27 = smov 0   ;;  %s1881_s28 = smov 0  }
   0x2   :  { %s1883_s29 = smov 0   ;;  %s1885_s30 = smov 0  }
   0x3 LB: > { %s1900_s9 = sadd.s32 4294967295, %s1817_s30   ;;  %s1562_s10 = sadd.s32 4294967294, %s1817_s30   ;;  %s1817_s30 = sphi %s1885_s30, %s2311_s30   ;;  %s1813_s29 = sphi %s1883_s29, %s2310_s29   ;;  %s1809_s28 = sphi %s1881_s28, %s2309_s28   ;;  %s1805_s27 = sphi %s1879_s27, %s2308_s27  }
   0x4   : > { %s1904_s11 = sadd.s32 1, %s1817_s30   ;;  %s211_s12 = sadd.s32 1, %s1813_s29 }
   0x5   : > { %s208_s13 = ssub.s32 %s1817_s30, %s1904_s11  ;;  %p221_p0 = scmp.ne.s32.totalorder %s1813_s29, %s1809_s28 }
   0x6   : > { %p209_p1 = scmp.eq.s32.totalorder %s208_s13, 0  ;;  %p222_p2 = scmp.eq.s32.totalorder %s1900_s9, 1 }
   0x7   : > { %p227_p3 = scmp.ne.s32.totalorder %s1809_s28, %s1805_s27  ;;  %p228_p4 = scmp.eq.s32.totalorder %s1562_s10, 1 }
   0x8   : > { %s1915_s14 = scalar_select %p209_p1, %s1813_s29, %s211_s12  }
   0x9   : > { %p1917_p5 = por %p222_p2, %p221_p0  ;;  %p1921_p6 = por %p228_p4, %p227_p3 }
   0xa   : > { %p1565_p7 = scmp.ge.s32.totalorder %s1817_s30, 1  ;;  %p282_p8 = scmp.lt.s32.totalorder %s1817_s30, 3 }
   0xc   : > { %p283_p9 = pnand %p1565_p7, %p282_p8 }
   0xd   : > { %p323_p10 = scmp.lt.s32.totalorder (!%p283_p9), %s1900_s9, 1  ;;  %s1823_s24 = smov (!%p283_p9), 64  }
   0xe   : > { %286 = sbr.rel (%p283_p9) target bundleno = 1523 (0x5f3), region = 52  ;;  %s1826_s13 = smov (!%p283_p9), 8  }
   0xf   : > { %s1827_s17 = smov (!%p283_p9), 4   ;;  %s1828_s18 = smov (!%p283_p9), 16  }
  0x10   : > { %s1829_s20 = smov (!%p283_p9), 12   ;;  %s1830_s21 = smov (!%p283_p9), 24  }
  0x13   : > { %v1931_v0 = vld [vmem:[%s2300_s3 + $0x18] sm:$0xff]   ;;  %v1819_v1 = vmov 0   ;;  %v1820_v2 = vmov 0.0   ;;  %s1935_s19 = scalar_select %p323_p10, %s1900_s9, 1  ;;  %v1941_v3 = vld [vmem:[%s2300_s3 + $0x10] sm:$0xff]   ;;  %vm1821_vm0 = vmmov 0   ;;  %v359_v8 = vlaneseq }
  0x14   : > { %1747 = vset.pattern.permute.xlu0 %v1819_v1  ;;  %1622 = vmatprep.subr.bf16.mxu0 %v1820_v2  ;;  %v1959_v4 = vld [vmem:[%s2300_s3 + $0x8] sm:$0xff]   ;;  %v1966_v6 = vld [vmem:[%s2300_s3] sm:$0xff]   ;;  %vm466_vm1 = vcmask 523264   ;;  %vm709_vm3 = vcmask 1041408   ;;  %v1822_v38 = vmov 1966171168  }
  0x15   : > { %1623 = vmatpush3.bf16.msra.mxu0 %v1931_v0  ;;  %1634 = vmatprep.subr.bf16.mxu1 %v1820_v2  ;;  %s1592_s22 = sshll.u32 %s1935_s19, 3  ;;  %v1986_v9 = vshrl.u32 %v359_v8, 7  ;;  %v362_v10 = vand.u32 127, %v359_v8  ;;  %s330_s23 = scalar_lea.vmem %s2298_s1, %s1935_s19  ;;  %v352_v32 = vld [vmem:[%s2302_s5] sm:$0x3]  ;;  %v514_v39 = vunpack.c.l.s4 %v1822_v38  ;;  %v2026_v48 = vld [vmem:[%s2303_s6 + $0x8] sm:$0xff] }
  0x16   : > { %1624 = vmatprep.subr.bf16.mxu0 %v1820_v2  ;;  %1630 = vmatprep.mubr.msk.bf16.mxu0 %vm1821_vm0, %v1820_v2  ;;  %s334_s25 = scalar_lea.vmem %s2299_s2, %s1592_s22  ;;  %s327_s12 = scalar_lea.vmem %s2297_s0, %s1592_s22  ;;  %v1570_v11 = vld [vmem:[%s330_s23] ss:$0 sm:$0xff]  ;;  %v2008_v33 = vsel %vm709_vm3, %v352_v32, 0  ;;  %vm617_vm4 = vcmask 31744   ;;  %vm689_vm5 = vcmask 1041409   ;;  %vm691_vm6 = vcmask 1042434  }
  0x17   : > { %1636 = vmatprep.mubr.msk.bf16.mxu1 %vm1821_vm0, %v1820_v2  ;;  %v358_v5 = vld [vmem:[%s334_s25] sm:$0xff]  ;;  %vm375_vm2 = vcmp.le.s32.totalorder %v1986_v9, %v362_v10  ;;  %v1995_v14 = vsub.s32 0, %v1986_v9  ;;  %v388_v16 = vsub.s32 1, %v1986_v9  ;;  %v395_v20 = vsub.s32 2, %v1986_v9  ;;  %1635 = vmatpush3.bf16.msra.mxu1 %v2008_v33  ;;  %s1831_s22 = smov 20   ;;  %s1832_s23 = smov 28  }
  0x18   : > { %365 = vperm.xlu0 %1747, %v358_v5   ;;  %v1970_v7 = vld [vmem:[%s327_s12] sm:$0xff]   ;;  %v1571_v12 = vsel %vm375_vm2, 1.0, %v1820_v2  ;;  %v402_v21 = vsub.s32 3, %v1986_v9  ;;  %v409_v24 = vsub.s32 4, %v1986_v9  ;;  %v416_v25 = vsub.s32 5, %v1986_v9  ;;  %1640 = vmatprep.subr.bf16.mxu1 %v1820_v2  ;;  %s320_s19 = sand.u32 1, %s1809_s28  }
  0x19   : > { %1625 = vmatpush3.bf16.msra.mxu0 %v1941_v3  ;;  %v423_v28 = vsub.s32 6, %v1986_v9  ;;  %v430_v29 = vsub.s32 7, %v1986_v9  ;;  %v515_v40 = vunpack.c.0.s8 %v514_v39  ;;  %v2015_v41 = vld [vmem:[%s2303_s6] sm:$0xff]  ;;  %vm693_vm7 = vcmask 1043459   ;;  %s1589_s25 = sshll.u32 %s1900_s9, 7  ;;  %s1833_s9 = smov [#allocation2]  }
  0x1a   : > { %1626 = vmatprep.subr.bf16.mxu0 %v1820_v2  ;;  %vm695_vm8 = vcmask 1044484   ;;  %vm697_vm9 = vcmask 1045509   ;;  %vm699_vm10 = vcmask 1046534   ;;  %vm701_vm11 = vcmask 1047559  }
  0x1b   : > { %v2018_v42 = vsub.s32 %v515_v40, %v1986_v9  ;;  %vm1454_vm12 = vcmask 64512   ;;  %vm1456_vm13 = vcmask 97280   ;;  %vm1458_vm14 = vcmask 130048  }
  0x1c   : > { %vm1460_vm15 = vcmask 162816   ;;  %vm1466_vm2 = vcmask 261120  }
  0x1d   : > { %1627 = vmatpush3.bf16.msra.mxu0 %v1959_v4 }
  0x1e   : > { %1628 = vmatprep.subr.bf16.mxu0 %v1820_v2 }
  0x21   : > { %1629 = vmatpush3.bf16.msra.mxu0 %v1966_v6 }
  0x22   : > { %1652 = vmatprep.subr.bf16.mxu0 %v1820_v2 }
  0x24   : > { %1631 = vmatmul.mubr.msk.bf16.vlgmr.msra.gmra.mxu0 %vm466_vm1, %v1970_v7 }
  0x25   : > { %1653 = vmatpush3.bf16.msra.mxu0 %v1931_v0  ;;  %1660 = vmatprep.mubr.msk.bf16.mxu0 %vm1821_vm0, %v1820_v2 }
  0x26   : > { %1654 = vmatprep.subr.bf16.mxu0 %v1820_v2 }
  0x29   : > { %1655 = vmatpush3.bf16.msra.mxu0 %v1941_v3 }
  0x2a   : > { %1656 = vmatprep.subr.bf16.mxu0 %v1820_v2 }
  0x2d   : > { %1657 = vmatpush3.bf16.msra.mxu0 %v1959_v4 }
  0x2e   : > { %1658 = vmatprep.subr.bf16.mxu0 %v1820_v2 }
  0x31   : > { %1659 = vmatpush3.bf16.msra.mxu0 %v1966_v6 }
  0x32   : > { %1682 = vmatprep.subr.bf16.mxu0 %v1820_v2 }
  0x93   : > { %v366_v13 = vpop.permute.xlu0 %365 }
  0x94   : > { %v374_v15 = vmul.f32 %v1570_v11, %v366_v13 }
  0x96   : > { %v378_v17 = vmul.f32 %v1571_v12, %v374_v15 }
  0x98   : > { %v389_v18 = vrot.slane %v378_v17, %v388_v16  ;;  %v382_v19 = vrot.slane %v378_v17, %v1995_v14  ;;  %v396_v22 = vrot.slane %v378_v17, %v395_v20  ;;  %v403_v23 = vrot.slane %v378_v17, %v402_v21 }
  0x99   : > { %v410_v26 = vrot.slane %v378_v17, %v409_v24  ;;  %v417_v27 = vrot.slane %v378_v17, %v416_v25  ;;  %v424_v30 = vrot.slane %v378_v17, %v423_v28  ;;  %v431_v31 = vrot.slane %v378_v17, %v430_v29 }
  0x9a   : > { %391 = vbcast.lane.b32.xlu1 %v389_v18, 256  ;;  %384 = vbcast.lane.b32.xlu0 %v382_v19, 256 }
  0x9e   : > { %398 = vbcast.lane.b32.xlu1 %v396_v22, 256  ;;  %405 = vbcast.lane.b32.xlu0 %v403_v23, 256 }
  0xa2   : > { %412 = vbcast.lane.b32.xlu1 %v410_v26, 256  ;;  %419 = vbcast.lane.b32.xlu0 %v417_v27, 256 }
  0xa6   : > { %426 = vbcast.lane.b32.xlu1 %v424_v30, 256  ;;  %433 = vbcast.lane.b32.xlu0 %v431_v31, 256 }
  0xe4   : > { %v504_v34 = vpop.f32.mrf.mxu0 }
  0xe5   : > { %v505_v43 = vadd.f32 %v504_v34, %v2015_v41 }
  0xe6   : > { %v1632_v35 = vpop.f32.mrf.mxu0 }
  0xe7   : > { %v519_v44 = vrot.slane %v505_v43, %v2018_v42  ;;  %v512_v46 = vcombine.high %v505_v43, %v505_v43 }
  0xe8   : > { %v507_v36 = vpop.f32.mrf.mxu0 }
  0xe9   : > { %v527_v45 = vcombine.high %v519_v44, %v519_v44  ;;  %v535_v47 = vrot.slane %v519_v44, %v2018_v42  ;;  %v526_v50 = vrot.slane %v512_v46, %v2018_v42  ;;  %v2031_v51 = vadd.f32 %v507_v36, %v2026_v48 }
  0xea   : > { %v1633_v37 = vpop.f32.mrf.mxu0 }
  0xeb   : > { %v549_v49 = vrot.slane %v527_v45, %v2018_v42  ;;  %v564_v53 = vrot.slane %v535_v47, %v1995_v14  ;;  %v557_v54 = vcombine.high %v535_v47, %v535_v47  ;;  %v528_v56 = vcombine.high %v526_v50, %v526_v50 }
  0xec   : > { %v542_v61 = vrot.slane %v526_v50, %v2018_v42 }
  0xed   : > { %v568_v52 = vrot.slane %v549_v49, %v1995_v14  ;;  %v559_v55 = vcombine.high %v549_v49, %v549_v49  ;;  %v601_v58 = vadd.f32 %v564_v53, %v2031_v51  ;;  %v572_v59 = vrot.slane %v557_v54, %v1995_v14 }
  0xee   : > { %v556_v8 = vrot.slane %v528_v56, %v2018_v42  ;;  %v580_v11 = vrot.slane %v542_v61, %v1995_v14  ;;  %v558_v23 = vcombine.high %v542_v61, %v542_v61 }
  0xef   : > { %v602_v57 = vadd.f32 %v568_v52, %v2031_v51  ;;  %v576_v60 = vrot.slane %v559_v55, %v1995_v14  ;;  %v603_v10 = vadd.f32 %v572_v59, %v2031_v51 }
  0xf0   : > { %v584_v16 = vrot.slane %v556_v8, %v1995_v14  ;;  %v560_v24 = vcombine.high %v556_v8, %v556_v8  ;;  %v605_v29 = vadd.f32 %v580_v11, %v2031_v51  ;;  %v588_v40 = vrot.slane %v558_v23, %v1995_v14 }
  0xf1   : > { %v604_v15 = vadd.f32 %v576_v60, %v2031_v51 }
  0xf2   : > { %v606_v30 = vadd.f32 %v584_v16, %v2031_v51  ;;  %v592_v43 = vrot.slane %v560_v24, %v1995_v14  ;;  %v607_v59 = vadd.f32 %v588_v40, %v2031_v51 }
 0x10c   : > { %v2040_v62 = vpop.permute.xlu1 %391  ;;  %v2042_v63 = vpop.permute.xlu0 %384 }
 0x10d   : > { %v610_v1 = vmul.f32 %v602_v57, %v2040_v62  ;;  %v609_v5 = vmul.f32 %v601_v58, %v2042_v63 }
 0x10f   : > { %v2050_v12 = vsel %vm617_vm4, %v610_v1, -inf  ;;  %v2053_v13 = vsel %vm617_vm4, %v609_v5, -inf  ;;  %v608_v5 = vadd.f32 %v592_v43, %v2031_v51 }
 0x110   : > { %v639_v17 = vrot.slane %v2050_v12, 4  ;;  %v633_v18 = vrot.slane %v2053_v13, 4  ;;  %v2059_v19 = vpop.permute.xlu1 %398  ;;  %v2061_v20 = vpop.permute.xlu0 %405 }
 0x111   : > { %v611_v21 = vmul.f32 %v603_v10, %v2059_v19  ;;  %v612_v22 = vmul.f32 %v604_v15, %v2061_v20 }
 0x112   : > { %v640_v25 = vmax.f32 %v2050_v12, %v639_v17  ;;  %v634_v26 = vmax.f32 %v2053_v13, %v633_v18 }
 0x113   : > { %v2068_v27 = vsel %vm617_vm4, %v611_v21, -inf  ;;  %v2071_v28 = vsel %vm617_vm4, %v612_v22, -inf }
 0x114   : > { %v641_v31 = vrot.slane %v640_v25, 2  ;;  %v635_v32 = vrot.slane %v634_v26, 2  ;;  %v645_v34 = vrot.slane %v2068_v27, 4  ;;  %v651_v35 = vrot.slane %v2071_v28, 4  ;;  %v2077_v36 = vpop.permute.xlu1 %412  ;;  %v2079_v37 = vpop.permute.xlu0 %419 }
 0x115   : > { %v613_v38 = vmul.f32 %v605_v29, %v2077_v36  ;;  %v614_v39 = vmul.f32 %v606_v30, %v2079_v37 }
 0x116   : > { %v642_v44 = vmax.f32 %v640_v25, %v641_v31  ;;  %v636_v45 = vmax.f32 %v634_v26, %v635_v32  ;;  %v646_v46 = vmax.f32 %v2068_v27, %v645_v34  ;;  %v652_v47 = vmax.f32 %v2071_v28, %v651_v35 }
 0x117   : > { %v622_v49 = vsel %vm617_vm4, %v613_v38, -inf  ;;  %v624_v50 = vsel %vm617_vm4, %v614_v39, -inf }
 0x118   : > { %v643_v52 = vrot.slane %v642_v44, 1  ;;  %v637_v53 = vrot.slane %v636_v45, 1  ;;  %v647_v54 = vrot.slane %v646_v46, 2  ;;  %v653_v55 = vrot.slane %v652_v47, 2  ;;  %v2089_v56 = vpop.permute.xlu1 %426  ;;  %v2092_v60 = vpop.permute.xlu0 %433 }
 0x119   : > { %v657_v57 = vrot.slane %v622_v49, 4  ;;  %v663_v58 = vrot.slane %v624_v50, 4  ;;  %v615_v11 = vmul.f32 %v607_v59, %v2089_v56  ;;  %v616_v18 = vmul.f32 %v608_v5, %v2092_v60 }
 0x11a   : > { %v648_v61 = vmax.f32 %v646_v46, %v647_v54  ;;  %v654_v1 = vmax.f32 %v652_v47, %v653_v55  ;;  %v644_v15 = vmax.f32 %v642_v44, %v643_v52  ;;  %v638_v16 = vmax.f32 %v636_v45, %v637_v53 }
 0x11b   : > { %v658_v8 = vmax.f32 %v622_v49, %v657_v57  ;;  %v664_v10 = vmax.f32 %v624_v50, %v663_v58  ;;  %v626_v24 = vsel %vm617_vm4, %v615_v11, -inf  ;;  %v628_v30 = vsel %vm617_vm4, %v616_v18, -inf  ;;  %v2129_v18 = vld [vmem:[%s2301_s4 + $0x8] sm:$0xff]  }
 0x11c   : > { %v649_v17 = vrot.slane %v648_v61, 1  ;;  %v655_v21 = vrot.slane %v654_v1, 1  ;;  %v669_v26 = vrot.slane %v626_v24, 4  ;;  %v675_v32 = vrot.slane %v628_v30, 4 }
 0x11d   : > { %v659_v22 = vrot.slane %v658_v8, 2  ;;  %v665_v23 = vrot.slane %v664_v10, 2  ;;  %v690_v34 = vsel %vm689_vm5, %v644_v15, %v638_v16  ;;  %v627_v46 = vmax.f32 %v2068_v27, %v626_v24 }
 0x11e   : > { %v650_v25 = vmax.f32 %v648_v61, %v649_v17  ;;  %v670_v31 = vmax.f32 %v626_v24, %v669_v26  ;;  %v656_v35 = vmax.f32 %v654_v1, %v655_v21  ;;  %v676_v44 = vmax.f32 %v628_v30, %v675_v32  ;;  %v2120_v17 = vld [vmem:[%s2301_s4 + $0x10] sm:$0xff]   ;;  %v2136_v21 = vld [vmem:[%s2301_s4] sm:$0xff]  }
 0x11f   : > { %v660_v29 = vmax.f32 %v658_v8, %v659_v22  ;;  %v666_v51 = vmax.f32 %v664_v10, %v665_v23  ;;  %v629_v47 = vmax.f32 %v2071_v28, %v628_v30  ;;  %v623_v55 = vmax.f32 %v2053_v13, %v622_v49 }
 0x120   : > { %v692_v40 = vsel %vm691_vm6, %v650_v25, %v690_v34  ;;  %v671_v43 = vrot.slane %v670_v31, 2  ;;  %v677_v53 = vrot.slane %v676_v44, 2  ;;  %v625_v57 = vmax.f32 %v2050_v12, %v624_v50  ;;  %v2113_v50 = vld [vmem:[%s2301_s4 + $0x18] sm:$0xff]  }
 0x121   : > { %v661_v38 = vrot.slane %v660_v29, 1  ;;  %v667_v39 = vrot.slane %v666_v51, 1  ;;  %v694_v54 = vsel %vm693_vm7, %v656_v35, %v692_v40  ;;  %v631_v5 = vmax.f32 %v627_v46, %v629_v47 }
 0x122   : > { %v672_v52 = vmax.f32 %v670_v31, %v671_v43  ;;  %v678_v1 = vmax.f32 %v676_v44, %v677_v53  ;;  %v630_v10 = vmax.f32 %v623_v55, %v625_v57 }
 0x123   : > { %v662_v45 = vmax.f32 %v660_v29, %v661_v38  ;;  %v668_v58 = vmax.f32 %v666_v51, %v667_v39 }
 0x124   : > { %v673_v61 = vrot.slane %v672_v52, 1  ;;  %v679_v27 = vrot.slane %v678_v1, 1  ;;  %v632_v13 = vmax.f32 %v630_v10, %v631_v5 }
 0x125   : > { %v696_v59 = vsel %vm695_vm8, %v662_v45, %v694_v54 }
 0x126   : > { %v674_v8 = vmax.f32 %v672_v52, %v673_v61  ;;  %v698_v28 = vsel %vm697_vm9, %v668_v58, %v696_v59  ;;  %v680_v11 = vmax.f32 %v678_v1, %v679_v27 }
 0x128   : > { %v700_v15 = vsel %vm699_vm10, %v674_v8, %v698_v28 }
 0x129   : > { %v702_v12 = vsel %vm701_vm11, %v680_v11, %v700_v15 }
 0x12a   : > { %v704_v49 = vmax.f32 %v632_v13, %v702_v12 }
 0x12c   : > { %v705_v16 = vpack.c.bf16 %v704_v49, %v704_v49 }
 0x12e   : > { %1637 = vmatmul.mubr.msk.bf16.vlgmr.msra.gmra.mxu1 %vm617_vm4, %v705_v16 }
 0x12f   : > { %1641 = vmatpush3.bf16.msra.mxu1 %v2113_v50  ;;  %1648 = vmatprep.mubr.msk.bf16.mxu1 %vm1821_vm0, %v1820_v2 }
 0x130   : > { %1642 = vmatprep.subr.bf16.mxu1 %v1820_v2 }
 0x133   : > { %1643 = vmatpush3.bf16.msra.mxu1 %v2120_v17 }
 0x134   : > { %1644 = vmatprep.subr.bf16.mxu1 %v1820_v2 }
 0x137   : > { %1645 = vmatpush3.bf16.msra.mxu1 %v2129_v18 }
 0x138   : > { %1646 = vmatprep.subr.bf16.mxu1 %v1820_v2 }
 0x13b   : > { %1647 = vmatpush3.bf16.msra.mxu1 %v2136_v21 }
 0x13c   : > { %1664 = vmatprep.subr.bf16.mxu1 %v1820_v2 }
 0x13e   : > { %1649 = vmatmul.mubr.msk.bf16.vlgmr.msra.gmra.mxu1 %vm466_vm1, %v1970_v7  ;;  %v2151_v7 = vld [vmem:[%s2304_s7] sm:$0xff] }
 0x13f   : > { %1665 = vmatpush3.bf16.msra.mxu1 %v2008_v33  ;;  %1666 = vmatprep.mubr.msk.bf16.mxu1 %vm1821_vm0, %v1820_v2  ;;  %v2156_v33 = vld [vmem:[%s2304_s7 + $0x8] sm:$0xff] }
 0x140   : > { %1670 = vmatprep.subr.bf16.mxu1 %v1820_v2 }
 0x1ee   : > { %v747_v22 = vpop.f32.mrf.mxu1 }
 0x1ef   : > { %754 = vrot.lane.b32.xlu1 %v747_v22, %s1823_s24 }
 0x1f0   : > { %v1638_v23 = vpop.f32.mrf.mxu1 }
 0x1f2   : > { %v750_v24 = vpop.f32.mrf.mxu1 }
 0x1f4   : > { %v1639_v25 = vpop.f32.mrf.mxu1 }
 0x1fe   : > { %v815_v26 = vpop.f32.mrf.mxu1 }
 0x1ff   : > { %v816_v29 = vadd.f32 %v815_v26, %v747_v22 }
 0x200   : > { %v1650_v51 = vpop.f32.mrf.mxu1 }
 0x201   : > { %v822_v35 = vadd.f32 %v816_v29, %v2151_v7 }
 0x202   : > { %v818_v30 = vpop.f32.mrf.mxu1 }
 0x204   : > { %v1651_v31 = vpop.f32.mrf.mxu1 }
 0x261   : > { %v755_v32 = vpop.permute.xlu1 %754 }
 0x262   : > { %v819_v34 = vadd.f32 %v818_v30, %v755_v32 }
 0x264   : > { %v823_v38 = vadd.f32 %v819_v34, %v2156_v33 }
 0x266   : > { %v2160_v39 = vpack.c.bf16 %v823_v38, %v822_v35 }
 0x268   : > { %1661 = vmatmul.mubr.msk.bf16.vlgmr.msra.gmra.mxu0 %vm466_vm1, %v2160_v39 }
 0x269   : > { %1683 = vmatpush3.bf16.msra.mxu0 %v1931_v0  ;;  %1690 = vmatprep.mubr.msk.bf16.mxu0 %vm1821_vm0, %v1820_v2 }
 0x26a   : > { %1684 = vmatprep.subr.bf16.mxu0 %v1820_v2 }
 0x26d   : > { %1685 = vmatpush3.bf16.msra.mxu0 %v1941_v3 }
 0x26e   : > { %1686 = vmatprep.subr.bf16.mxu0 %v1820_v2 }
 0x271   : > { %1687 = vmatpush3.bf16.msra.mxu0 %v1959_v4 }
 0x272   : > { %1688 = vmatprep.subr.bf16.mxu0 %v1820_v2 }
 0x275   : > { %1689 = vmatpush3.bf16.msra.mxu0 %v1966_v6 }
 0x328   : > { %v862_v40 = vpop.f32.mrf.mxu0 }
 0x329   : > { %v863_v43 = vadd.f32 %v862_v40, %v2015_v41 }
 0x32a   : > { %v1662_v44 = vpop.f32.mrf.mxu0 }
 0x32b   : > { %v870_v0 = vcombine.high %v863_v43, %v863_v43  ;;  %v877_v45 = vrot.slane %v863_v43, %v2018_v42 }
 0x32c   : > { %v865_v46 = vpop.f32.mrf.mxu0 }
 0x32d   : > { %v884_v47 = vrot.slane %v870_v0, %v2018_v42  ;;  %v885_v52 = vcombine.high %v877_v45, %v877_v45  ;;  %v893_v3 = vrot.slane %v877_v45, %v2018_v42  ;;  %v866_v58 = vadd.f32 %v865_v46, %v2026_v48 }
 0x32e   : > { %v1663_v53 = vpop.f32.mrf.mxu0 }
 0x32f   : > { %v886_v54 = vcombine.high %v884_v47, %v884_v47  ;;  %v900_v4 = vrot.slane %v884_v47, %v2018_v42  ;;  %v907_v55 = vrot.slane %v885_v52, %v2018_v42  ;;  %v915_v6 = vcombine.high %v893_v3, %v893_v3 }
 0x330   : > { %v922_v57 = vrot.slane %v893_v3, %v1995_v14 }
 0x331   : > { %v914_v59 = vrot.slane %v886_v54, %v2018_v42  ;;  %v916_v61 = vcombine.high %v900_v4, %v900_v4  ;;  %v917_v1 = vcombine.high %v907_v55, %v907_v55  ;;  %v926_v5 = vrot.slane %v907_v55, %v1995_v14 }
 0x332   : > { %v930_v8 = vrot.slane %v915_v6, %v1995_v14  ;;  %v938_v27 = vrot.slane %v900_v4, %v1995_v14  ;;  %v959_v10 = vadd.f32 %v922_v57, %v866_v58 }
 0x333   : > { %v918_v28 = vcombine.high %v914_v59, %v914_v59  ;;  %v934_v11 = vrot.slane %v917_v1, %v1995_v14  ;;  %v942_v15 = vrot.slane %v914_v59, %v1995_v14  ;;  %v946_v13 = vrot.slane %v916_v61, %v1995_v14 }
 0x334   : > { %v960_v12 = vadd.f32 %v926_v5, %v866_v58  ;;  %v961_v49 = vadd.f32 %v930_v8, %v866_v58  ;;  %v963_v16 = vadd.f32 %v938_v27, %v866_v58  ;;  %v967_v22 = vmul.f32 %v959_v10, %v2042_v63 }
 0x335   : > { %v950_v23 = vrot.slane %v918_v28, %v1995_v14  ;;  %v962_v24 = vadd.f32 %v934_v11, %v866_v58  ;;  %v964_v25 = vadd.f32 %v942_v15, %v866_v58  ;;  %v965_v26 = vadd.f32 %v946_v13, %v866_v58 }
 0x336   : > { %v968_v29 = vmul.f32 %v960_v12, %v2040_v62  ;;  %v969_v51 = vmul.f32 %v961_v49, %v2059_v19  ;;  %v971_v30 = vmul.f32 %v963_v16, %v2077_v36  ;;  %v2194_v31 = vsel %vm617_vm4, %v967_v22, -inf }
 0x337   : > { %v966_v32 = vadd.f32 %v950_v23, %v866_v58  ;;  %v970_v34 = vmul.f32 %v962_v24, %v2061_v20  ;;  %v972_v35 = vmul.f32 %v964_v25, %v2079_v37  ;;  %v973_v63 = vmul.f32 %v965_v26, %v2089_v56 }
 0x338   : > { %v2200_v38 = vsel %vm617_vm4, %v968_v29, -inf  ;;  %v977_v40 = vsel %vm617_vm4, %v969_v51, -inf  ;;  %v990_v62 = vrot.slane %v2194_v31, 4  ;;  %v979_v36 = vsel %vm617_vm4, %v971_v30, -inf }
 0x339   : > { %v978_v19 = vsel %vm617_vm4, %v970_v34, -inf  ;;  %v974_v43 = vmul.f32 %v966_v32, %v2092_v60  ;;  %v981_v44 = vsel %vm617_vm4, %v972_v35, -inf  ;;  %v996_v37 = vrot.slane %v2200_v38, 4 }
 0x33a   : > { %v991_v20 = vmax.f32 %v2194_v31, %v990_v62  ;;  %v983_v56 = vsel %vm617_vm4, %v973_v63, -inf  ;;  %v1002_v0 = vrot.slane %v977_v40, 4  ;;  %v1008_v45 = vrot.slane %v978_v19, 4 }
 0x33b   : > { %v997_v47 = vmax.f32 %v2200_v38, %v996_v37  ;;  %v1014_v53 = vrot.slane %v979_v36, 4  ;;  %v1020_v54 = vrot.slane %v981_v44, 4  ;;  %v985_v4 = vsel %vm617_vm4, %v974_v43, -inf }
 0x33c   : > { %v992_v46 = vrot.slane %v991_v20, 2  ;;  %v1003_v52 = vmax.f32 %v977_v40, %v1002_v0  ;;  %v1009_v3 = vmax.f32 %v978_v19, %v1008_v45  ;;  %v1026_v6 = vrot.slane %v983_v56, 4 }
 0x33d   : > { %v998_v55 = vrot.slane %v997_v47, 2  ;;  %v1015_v59 = vmax.f32 %v979_v36, %v1014_v53  ;;  %v1021_v61 = vmax.f32 %v981_v44, %v1020_v54  ;;  %v986_v15 = vmax.f32 %v978_v19, %v985_v4 }
 0x33e   : > { %v993_v60 = vmax.f32 %v991_v20, %v992_v46  ;;  %v1004_v57 = vrot.slane %v1003_v52, 2  ;;  %v1010_v58 = vrot.slane %v1009_v3, 2  ;;  %v1027_v8 = vmax.f32 %v983_v56, %v1026_v6 }
 0x33f   : > { %v999_v5 = vmax.f32 %v997_v47, %v998_v55  ;;  %v1016_v28 = vrot.slane %v1015_v59, 2  ;;  %v1022_v11 = vrot.slane %v1021_v61, 2  ;;  %v1032_v49 = vrot.slane %v985_v4, 4 }
 0x340   : > { %v994_v1 = vrot.slane %v993_v60, 1  ;;  %v1005_v27 = vmax.f32 %v1003_v52, %v1004_v57  ;;  %v1011_v10 = vmax.f32 %v1009_v3, %v1010_v58  ;;  %v1028_v12 = vrot.slane %v1027_v8, 2 }
 0x341   : > { %v1000_v13 = vrot.slane %v999_v5, 1  ;;  %v1017_v23 = vmax.f32 %v1015_v59, %v1016_v28  ;;  %v1023_v24 = vmax.f32 %v1021_v61, %v1022_v11  ;;  %v1033_v51 = vmax.f32 %v985_v4, %v1032_v49 }
 0x342   : > { %v1006_v16 = vrot.slane %v1005_v27, 1  ;;  %v1012_v22 = vrot.slane %v1011_v10, 1  ;;  %v995_v25 = vmax.f32 %v993_v60, %v994_v1  ;;  %v1029_v29 = vmax.f32 %v1027_v8, %v1028_v12 }
 0x343   : > { %v1001_v26 = vmax.f32 %v999_v5, %v1000_v13  ;;  %v1018_v34 = vrot.slane %v1017_v23, 1  ;;  %v1024_v35 = vrot.slane %v1023_v24, 1  ;;  %v1034_v62 = vrot.slane %v1033_v51, 2 }
 0x344   : > { %v1007_v30 = vmax.f32 %v1005_v27, %v1006_v16  ;;  %v1013_v32 = vmax.f32 %v1011_v10, %v1012_v22  ;;  %v1030_v63 = vrot.slane %v1029_v29, 1  ;;  %v982_v19 = vmax.f32 %v2200_v38, %v981_v44 }
 0x345   : > { %v1046_v43 = vsel %vm689_vm5, %v1001_v26, %v995_v25  ;;  %v984_v20 = vmax.f32 %v977_v40, %v983_v56  ;;  %v1019_v37 = vmax.f32 %v1017_v23, %v1018_v34  ;;  %v1025_v45 = vmax.f32 %v1023_v24, %v1024_v35 }
 0x346   : > { %v1047_v0 = vsel %vm691_vm6, %v1007_v30, %v1046_v43  ;;  %v1035_v46 = vmax.f32 %v1033_v51, %v1034_v62  ;;  %v980_v52 = vmax.f32 %v2194_v31, %v979_v36  ;;  %v1031_v53 = vmax.f32 %v1029_v29, %v1030_v63 }
 0x347   : > { %v1048_v47 = vsel %vm693_vm7, %v1013_v32, %v1047_v0  ;;  %v988_v3 = vmax.f32 %v984_v20, %v986_v15  ;;  %v1824_v12 = vmov 1983009808   ;;  %v1825_v43 = vmov 1934713408  }
 0x348   : > { %v1049_v54 = vsel %vm695_vm8, %v1019_v37, %v1048_v47  ;;  %v1036_v4 = vrot.slane %v1035_v46, 1  ;;  %v987_v55 = vmax.f32 %v980_v52, %v982_v19  ;;  %v1292_v49 = vunpack.c.l.s4 %v1824_v12 }
 0x349   : > { %v1050_v60 = vsel %vm697_vm9, %v1025_v45, %v1049_v54  ;;  %v1356_v19 = vunpack.c.l.s4 %v1825_v43 }
 0x34a   : > { %v1051_v38 = vsel %vm699_vm10, %v1031_v53, %v1050_v60  ;;  %v1037_v40 = vmax.f32 %v1035_v46, %v1036_v4  ;;  %v989_v44 = vmax.f32 %v987_v55, %v988_v3  ;;  %v1293_v29 = vunpack.c.0.s8 %v1292_v49 }
 0x34b   : > { %v1357_v55 = vunpack.c.0.s8 %v1356_v19 }
 0x34c   : > { %v1052_v56 = vsel %vm701_vm11, %v1037_v40, %v1051_v38  ;;  %v1296_v52 = vsub.s32 %v1293_v29, %v1986_v9 }
 0x34d   : > { %v1054_v6 = vmax.f32 %v989_v44, %v1052_v56 }
 0x34f   : > { %v1055_v57 = vpack.c.bf16 %v1054_v6, %v1054_v6 }
 0x351   : > { %1667 = vmatmul.mubr.msk.bf16.vlgmr.msra.gmra.mxu1 %vm617_vm4, %v1055_v57 }
 0x352   : > { %1671 = vmatpush3.bf16.msra.mxu1 %v2113_v50  ;;  %1678 = vmatprep.mubr.msk.bf16.mxu1 %vm1821_vm0, %v1820_v2  ;;  %vm1462_vm0 = vcmask 195584  }
 0x353   : > { %1672 = vmatprep.subr.bf16.mxu1 %v1820_v2 }
 0x356   : > { %1673 = vmatpush3.bf16.msra.mxu1 %v2120_v17 }
 0x357   : > { %1674 = vmatprep.subr.bf16.mxu1 %v1820_v2 }
 0x35a   : > { %1675 = vmatpush3.bf16.msra.mxu1 %v2129_v18 }
 0x35b   : > { %1676 = vmatprep.subr.bf16.mxu1 %v1820_v2 }
 0x35e   : > { %1677 = vmatpush3.bf16.msra.mxu1 %v2136_v21 }
 0x361   : > { %1679 = vmatmul.mubr.msk.bf16.vlgmr.msra.gmra.mxu1 %vm466_vm1, %v2160_v39 }
 0x411   : > { %v1093_v31 = vpop.f32.mrf.mxu1 }
 0x412   : > { %1100 = vrot.lane.b32.xlu0 %v1093_v31, %s1823_s24  ;;  %s1566_s24 = sshll.u32 %s320_s19, 3 }
 0x413   : > { %v1668_v50 = vpop.f32.mrf.mxu1  ;;  %s322_s26 = scalar_lea.vmem [#allocation2], %s1566_s24 }
 0x414   : > { %s1482_s10 = sshll.u32 %s322_s26, 4  ;;  %s1483_s10 = int_to_ptr.vmem [resolvable:$true] %s1482_s10 }
 0x415   : > { %v1096_v36 = vpop.f32.mrf.mxu1 }
 0x417   : > { %v1669_v58 = vpop.f32.mrf.mxu1 }
 0x418   : > { %v1360_v58 = vsub.s32 %v1357_v55, %v1986_v9 }
 0x421   : > { %v1137_v59 = vpop.f32.mrf.mxu1 }
 0x422   : > { %v1138_v61 = vadd.f32 %v1137_v59, %v1093_v31 }
 0x423   : > { %v1680_v17 = vpop.f32.mrf.mxu1 }
 0x424   : > { %v1144_v2 = vadd.f32 %v1138_v61, %v2151_v7 }
 0x425   : > { %v1140_v1 = vpop.f32.mrf.mxu1 }
 0x427   : > { %v1681_v5 = vpop.f32.mrf.mxu1 }
 0x484   : > { %v1101_v8 = vpop.permute.xlu0 %1100 }
 0x485   : > { %v1141_v18 = vadd.f32 %v1140_v1, %v1101_v8 }
 0x487   : > { %v1145_v21 = vadd.f32 %v1141_v18, %v2156_v33 }
 0x489   : > { %v1146_v27 = vpack.c.bf16 %v1145_v21, %v1144_v2 }
 0x48b   : > { %1691 = vmatmul.mubr.msk.bf16.vlgmr.msra.gmra.mxu0 %vm466_vm1, %v1146_v27  ;;  %vm1464_vm1 = vcmask 228352  }
 0x54b   : > { %v1184_v39 = vpop.f32.mrf.mxu0 }
 0x54c   : > { %v1185_v10 = vadd.f32 %v1184_v39, %v2015_v41 }
 0x54d   : > { %v1692_v28 = vpop.f32.mrf.mxu0 }
 0x54e   : > { %v1192_v11 = vcombine.high %v1185_v10, %v1185_v10  ;;  %v1199_v15 = vrot.slane %v1185_v10, %v2018_v42 }
 0x54f   : > { %v1187_v13 = vpop.f32.mrf.mxu0 }
 0x550   : > { %v1206_v16 = vrot.slane %v1192_v11, %v2018_v42  ;;  %v1207_v22 = vcombine.high %v1199_v15, %v1199_v15  ;;  %v1215_v7 = vrot.slane %v1199_v15, %v2018_v42  ;;  %v1188_v62 = vadd.f32 %v1187_v13, %v2026_v48 }
 0x551   : > { %v1693_v23 = vpop.f32.mrf.mxu0 }
 0x552   : > { %v1208_v33 = vcombine.high %v1206_v16, %v1206_v16  ;;  %v1222_v24 = vrot.slane %v1206_v16, %v2018_v42  ;;  %v1229_v25 = vrot.slane %v1207_v22, %v2018_v42  ;;  %v1237_v26 = vcombine.high %v1215_v7, %v1215_v7 }
 0x553   : > { %v1244_v41 = vrot.slane %v1215_v7, %v1995_v14 }
 0x554   : > { %v1236_v51 = vrot.slane %v1208_v33, %v2018_v42  ;;  %v1238_v30 = vcombine.high %v1222_v24, %v1222_v24  ;;  %v1239_v32 = vcombine.high %v1229_v25, %v1229_v25  ;;  %v1248_v34 = vrot.slane %v1229_v25, %v1995_v14 }
 0x555   : > { %v1252_v35 = vrot.slane %v1237_v26, %v1995_v14  ;;  %v1260_v63 = vrot.slane %v1222_v24, %v1995_v14  ;;  %v1281_v42 = vadd.f32 %v1244_v41, %v1188_v62 }
 0x556   : > { %v1240_v20 = vcombine.high %v1236_v51, %v1236_v51  ;;  %v1256_v37 = vrot.slane %v1239_v32, %v1995_v14  ;;  %v1264_v0 = vrot.slane %v1236_v51, %v1995_v14  ;;  %v1268_v45 = vrot.slane %v1238_v30, %v1995_v14 }
 0x557   : > { %v1282_v46 = vadd.f32 %v1248_v34, %v1188_v62  ;;  %v1283_v47 = vadd.f32 %v1252_v35, %v1188_v62  ;;  %v1285_v54 = vadd.f32 %v1260_v63, %v1188_v62 }
 0x558   : > { %v1272_v3 = vrot.slane %v1240_v20, %v1995_v14  ;;  %v1284_v53 = vadd.f32 %v1256_v37, %v1188_v62  ;;  %v1287_v4 = vadd.f32 %v1268_v45, %v1188_v62  ;;  %v1286_v48 = vadd.f32 %v1264_v0, %v1188_v62 }
 0x559   : > { %v1289_v60 = vcombine.low %v1281_v42, %v1283_v47  ;;  %v1290_v6 = vcombine.high %v1281_v42, %v1283_v47 }
 0x55a   : > { %v1288_v38 = vadd.f32 %v1272_v3, %v1188_v62  ;;  %v1305_v40 = vcombine.low %v1282_v46, %v1284_v53  ;;  %v1321_v44 = vcombine.low %v1285_v54, %v1287_v4  ;;  %v1306_v56 = vcombine.high %v1282_v46, %v1284_v53 }
 0x55b   : > { %v1322_v57 = vcombine.high %v1285_v54, %v1287_v4  ;;  %v1297_v31 = vrot.slane %v1289_v60, %v1296_v52  ;;  %v1304_v8 = vrot.slane %v1290_v6, %v1296_v52 }
 0x55c   : > { %v1313_v50 = vrot.slane %v1305_v40, %v1296_v52  ;;  %v1337_v36 = vcombine.low %v1286_v48, %v1288_v38  ;;  %v1320_v59 = vrot.slane %v1306_v56, %v1296_v52  ;;  %v1338_v61 = vcombine.high %v1286_v48, %v1288_v38 }
 0x55d   : > { %v1329_v14 = vrot.slane %v1321_v44, %v1296_v52  ;;  %v1336_v18 = vrot.slane %v1322_v57, %v1296_v52 }
 0x55e   : > { %v1345_v17 = vrot.slane %v1337_v36, %v1296_v52  ;;  %v1354_v1 = vcombine.high %v1297_v31, %v1313_v50  ;;  %v1353_v5 = vcombine.low %v1297_v31, %v1313_v50  ;;  %v1352_v2 = vrot.slane %v1338_v61, %v1296_v52 }
 0x55f   : > { %v1369_v39 = vcombine.low %v1304_v8, %v1320_v59  ;;  %v1370_v23 = vcombine.high %v1304_v8, %v1320_v59 }
 0x560   : > { %v1386_v21 = vcombine.high %v1329_v14, %v1345_v17  ;;  %v1385_v27 = vcombine.low %v1329_v14, %v1345_v17  ;;  %v1401_v10 = vcombine.low %v1336_v18, %v1352_v2  ;;  %v1368_v28 = vrot.slane %v1354_v1, %v1360_v58 }
 0x561   : > { %v1361_v15 = vrot.slane %v1353_v5, %v1360_v58  ;;  %v1402_v12 = vcombine.high %v1336_v18, %v1352_v2  ;;  %v1377_v7 = vrot.slane %v1369_v39, %v1360_v58  ;;  %v1384_v26 = vrot.slane %v1370_v23, %v1360_v58 }
 0x562   : > { %v1400_v11 = vrot.slane %v1386_v21, %v1360_v58  ;;  %v1393_v13 = vrot.slane %v1385_v27, %v1360_v58  ;;  %v1409_v16 = vrot.slane %v1401_v10, %v1360_v58 }
 0x563   : > { %v1416_v25 = vrot.slane %v1402_v12, %v1360_v58 }
 0x564   : > { %v1419_v49 = vcombine.low %v1368_v28, %v1400_v11  ;;  %v1418_v9 = vcombine.high %v1361_v15, %v1393_v13  ;;  %v1417_v22 = vcombine.low %v1361_v15, %v1393_v13  ;;  %v1421_v33 = vcombine.low %v1377_v7, %v1409_v16 }
 0x565   : > { %v1420_v24 = vcombine.high %v1368_v28, %v1400_v11  ;;  %v1423_v41 = vcombine.low %v1384_v26, %v1416_v25  ;;  %v1422_v29 = vcombine.high %v1377_v7, %v1409_v16  ;;  %v1424_v51 = vcombine.high %v1384_v26, %v1416_v25 }
 0x566   : > { %1430 = vrot.lane.b32.xlu0 %v1419_v49, %s1826_s13  ;;  %1426 = vrot.lane.b32.xlu1 %v1418_v9, %s1827_s17  ;;  %s2262_s17 = scalar_lea.hbm %s2305_s8, %s1589_s25 }
 0x56a   : > { %1438 = vrot.lane.b32.xlu0 %v1421_v33, %s1828_s18  ;;  %1434 = vrot.lane.b32.xlu1 %v1420_v24, %s1829_s20  ;;  %s1469_s18 = scalar_lea.sflag [#allocation3], %s320_s19  ;;  %s1757_s20 = scalar_lea.vmem %s1483_s10, 128 }
 0x56b   : > { %p1758_p11 = scmp.ne.s32.totalorder %s1483_s10, %s1757_s20 }
 0x56d   : > { %p1759_p12 = pnand %p1758_p11, %p1917_p5 }
 0x56e   : > { %1446 = vrot.lane.b32.xlu0 %v1423_v41, %s1830_s21  ;;  %1442 = vrot.lane.b32.xlu1 %v1422_v29, %s1831_s22  ;;  %s1761_s21 = sshll.u32 %s1833_s9, 4  ;;  %s1762_s21 = int_to_ptr.vmem [resolvable:$false] %s1761_s21 }
 0x56f   : > { %p1760_p13 = pneg %p1759_p12  ;;  %s1763_s22 = scalar_lea.vmem %s1762_s21, 256 }
 0x570   : > { %p1764_p0 = scmp.lt.s32.totalorder %s1483_s10, %s1762_s21  ;;  %p1765_p1 = scmp.lt.s32.totalorder %s1763_s22, %s1757_s20 }
 0x572   : > { %1450 = vrot.lane.b32.xlu1 %v1424_v51, %s1832_s23  ;;  %p1766_p2 = por %p1765_p1, %p1764_p0 }
 0x574   : > { %p1767_p3 = pnand %p1766_p2, %p1760_p13 }
 0x5d8   : > { %v1431_v30 = vpop.permute.xlu0 %1430  ;;  %v1427_v32 = vpop.permute.xlu1 %1426 }
 0x5d9   : > { %v1453_v34 = vsel %vm617_vm4, %v1417_v22, %v1427_v32 }
 0x5da   : > { %v1455_v62 = vsel %vm1454_vm12, %v1453_v34, %v1431_v30 }
 0x5dc   : > { %v1439_v35 = vpop.permute.xlu0 %1438  ;;  %v1435_v63 = vpop.permute.xlu1 %1434 }
 0x5dd   : > { %v1457_v43 = vsel %vm1456_vm13, %v1455_v62, %v1435_v63 }
 0x5de   : > { %v1459_v20 = vsel %vm1458_vm14, %v1457_v43, %v1439_v35 }
 0x5e0   : > { %v1443_v19 = vpop.permute.xlu1 %1442  ;;  %v1447_v37 = vpop.permute.xlu0 %1446 }
 0x5e1   : > { %v1461_v0 = vsel %vm1460_vm15, %v1459_v20, %v1443_v19 }
 0x5e2   : > { %v1463_v42 = vsel %vm1462_vm0, %v1461_v0, %v1447_v37 }
 0x5e4   : > { %v1451_v45 = vpop.permute.xlu1 %1450 }
 0x5e5   : > { %v1465_v46 = vsel %vm1464_vm1, %v1463_v42, %v1451_v45 }
 0x5e6   : > { %1467 = vst.msk [vmem:[%s322_s26] sm:$0xff] %vm1466_vm2, %v1465_v46 }
 0x5e7   : > { %1770 = shalt.err (!%p1767_p3)
}
 0x5e8   : > { %s1771_s23 = scalar_lea.hbm %s2262_s17, 128  ;;  %s1775_s25 = scalar_lea.hbm %s2305_s8, 256 }
 0x5e9   : > { %p1772_p4 = scmp.ne.s32.totalorder %s2262_s17, %s1771_s23  ;;  %p1776_p9 = scmp.lt.s32.totalorder %s2262_s17, %s2305_s8 }
 0x5ea   : > { %p1777_p10 = scmp.lt.s32.totalorder %s1775_s25, %s1771_s23 }
 0x5eb   : > { %p1773_p7 = pnand %p1772_p4, %p1917_p5 }
 0x5ec   : > { %p1778_p11 = por %p1777_p10, %p1776_p9 }
 0x5ed   : > { %p1774_p8 = pneg %p1773_p7 }
 0x5ef   : > { %p1779_p12 = pnand %p1778_p11, %p1774_p8 }
 0x5f1   : > { %1782 = shalt.err (!%p1779_p12)
}
 0x5f2   : > { %1694 = dma.vmem_to_hbm [thread:$0]  (%p1917_p5), %s1483_s10, 128, %s2262_s17, %s1469_s18  }
 0x5f3 PF: > { %p1700_p13 = scmp.ge.s32.totalorder %s1817_s30, 2  ;;  %s1494_s13 = sand.u32 1, %s1805_s27  }
 0x5f4   : > { %s1495_s20 = scalar_lea.sflag [#allocation3], %s1494_s13 }
 0x5f5   : > { %p1697_p0 = pnand %p1700_p13, %p1921_p6 }
 0x5f7   : > { %p1698_p1 = pneg %p1697_p0 }
 0x5f9   : > { %1800 = dma.done.wait (%p1698_p1), %s1495_s20, 128  }
 0x5fa   : > { %1802 = vsyncadd (%p1698_p1), %s1495_s20, 4294967168  ;;  %p18_p2 = scmp.ge.s32.totalorder %s1904_s11, 4   ;;  %s2308_s27 = smov %s1809_s28 }
 0x5fb   : > { %s2309_s28 = smov %s1813_s29  ;;  %s2310_s29 = smov %s1915_s14 }
 0x5fc   : > { %s2311_s30 = smov %s1904_s11  ;;  %20 = sbr.rel (!%p18_p2) target bundleno = 3 (0x3), region = 93 }
 0x601   :  { %1500 = vsyncpa [#allocation3], 1 }
 0x602   :  { %1502 = vsyncpa [#allocation3 + $0x1], 1 }

</bundles_post_ra>
